<compile_context>
chip_gen: v6e
topology: v6e:2x2x1
jax: 0.10.0
libtpu: 0.0.40
codegen_flags: <defaults>
</compile_context>

<pallas_src>
import functools

import jax
import jax.numpy as jnp
from jax.experimental import pallas as pl
from jax.experimental.pallas import tpu as pltpu


def _cdiv(a, b):
    return -(-a // b)


def se_kernel(inv_hw, alpha_ref, x_ref, w1t_ref, w2t_ref, o_ref):
    """One block: x_ref (TB, C, HW); w1t (C, Cr); w2t (Cr, C); alpha (1,) in SMEM."""
    x = x_ref[...]                                               # input dtype, read once

    # Squeeze: global average pool over the lane-dense spatial axis (f32 accumulation).
    pooled = jnp.sum(x.astype(jnp.float32), axis=-1) * inv_hw    # (TB, C)

    # Excite: two dense 2D MXU matmuls (weights arrive pre-transposed from the wrapper).
    h = jnp.dot(pooled, w1t_ref[...], preferred_element_type=jnp.float32)   # (TB, Cr)
    a = alpha_ref[0]
    h = jnp.where(h >= 0.0, h, a * h)                            # PReLU (shared alpha)
    s = jax.nn.sigmoid(
        jnp.dot(h, w2t_ref[...], preferred_element_type=jnp.float32))       # (TB, C)

    # Scale: broadcast the per-(sample, channel) scale over the spatial axis.
    # Multiply runs in the input dtype (bf16 on v6e/v7x halves VALU work; f32 exact).
    o_ref[...] = (x * s[..., None].astype(x.dtype)).astype(o_ref.dtype)


def se_module(x_nchw, w1, w2, alpha, *, vmem_limit_bytes=None):
    """x_nchw: (N, C, H, W); w1: (C//r, C); w2: (C, C//r); alpha: (1,) shared PReLU."""
    N, C, H, W = x_nchw.shape
    HW = H * W
    Cr = w1.shape[0]
    out_dtype = x_nchw.dtype
    itemsize = jnp.dtype(x_nchw.dtype).itemsize

    # --- VMEM budget / generation heuristic ------------------------------------
    vmem_phys = None
    try:
        vmem_phys = int(pltpu.get_tpu_info().vmem_capacity_bytes)
    except Exception:
        vmem_phys = None
    if vmem_limit_bytes is None:
        if vmem_phys is not None and vmem_phys >= 100 * 1024 * 1024:
            vmem_limit_bytes = 96 * 1024 * 1024     # v5e / v6e: 128 MiB physical VMEM
        else:
            vmem_limit_bytes = 48 * 1024 * 1024     # v7x (64 MiB physical) / unknown
    vmem_limit_bytes = int(vmem_limit_bytes)
    likely_two_tc = (vmem_phys is None) or (vmem_phys < 100 * 1024 * 1024)

    # --- samples per block (TB) -------------------------------------------------
    # Live VMEM per sample: in block + out block (each double-buffered by the
    # pipeline) + tiny f32 intermediates (pooled/h/s).  Weights are small but
    # also double-buffered; count them once up front.
    per_sample_bytes = 4 * C * HW * itemsize + 16 * (C + Cr)
    weight_bytes = 2 * 2 * 4 * C * Cr
    budget = (vmem_limit_bytes * 3) // 4
    tb_cap = max(1, (budget - weight_bytes) // per_sample_bytes)
    tb = int(min(N, tb_cap))
    if likely_two_tc:
        # Keep >= 2 (preferably >= 4) grid steps so both v7x TensorCores get work.
        if N >= 4:
            tb = min(tb, _cdiv(N, 4))
        elif N >= 2:
            tb = min(tb, _cdiv(N, 2))
    tb = max(1, int(tb))
    grid_n = _cdiv(N, tb)

    # Free reshapes only -- no HBM pad/slice roundtrips.
    x3 = x_nchw.reshape(N, C, HW)
    w1t = w1.astype(jnp.float32).T              # (C, Cr)  fc1 weight, pre-transposed
    w2t = w2.astype(jnp.float32).T              # (Cr, C)  fc2 weight, pre-transposed
    alpha_f = alpha.astype(jnp.float32).reshape((1,))

    kernel = functools.partial(se_kernel, float(1.0 / HW))

    out = pl.pallas_call(
        kernel,
        out_shape=jax.ShapeDtypeStruct((N, C, HW), out_dtype),
        grid_spec=pltpu.PrefetchScalarGridSpec(
            num_scalar_prefetch=0,
            grid=(grid_n,),
            in_specs=[
                pl.BlockSpec(memory_space=pltpu.SMEM),            # alpha (scalar)
                pl.BlockSpec((tb, C, HW), lambda n: (n, 0, 0)),   # x  (TB samples)
                pl.BlockSpec((C, Cr), lambda n: (0, 0)),          # fc1 weight (pre-T)
                pl.BlockSpec((Cr, C), lambda n: (0, 0)),          # fc2 weight (pre-T)
            ],
            out_specs=pl.BlockSpec((tb, C, HW), lambda n: (n, 0, 0)),
        ),
        compiler_params=pltpu.CompilerParams(
            dimension_semantics=("parallel",),
            vmem_limit_bytes=vmem_limit_bytes,
        ),
    )(alpha_f, x3, w1t, w2t)

    return out.reshape(N, C, H, W)


def se_reference(x_nchw, w1, w2, alpha):
    """Pure-JAX reference matching the PyTorch SEModule forward (f32 math)."""
    xf = x_nchw.astype(jnp.float32)
    pooled = jnp.mean(xf, axis=(2, 3))                    # (N, C)
    h = pooled @ w1.astype(jnp.float32).T                 # (N, C//r)
    h = jnp.where(h >= 0.0, h, alpha[0] * h)              # PReLU (shared alpha)
    s = jax.nn.sigmoid(h @ w2.astype(jnp.float32).T)      # (N, C)
    return xf * s[:, :, None, None]


if __name__ == "__main__":
    # Shapes consistent with SEModule inside residual_unit_SE, kept small:
    # N=2, C=4, reduction=2 (C//r=2), H=W=16  ->  HW=256.
    N, C, H, W = 2, 4, 16, 16
    reduction = 2
    Cr = C // reduction

    key = jax.random.PRNGKey(0)
    kx, k1, k2 = jax.random.split(key, 3)
    x = jax.random.normal(kx, (N, C, H, W), dtype=jnp.float32)
    w1 = jax.random.normal(k1, (Cr, C), dtype=jnp.float32) * 0.5   # Conv2d 1x1, no bias
    w2 = jax.random.normal(k2, (C, Cr), dtype=jnp.float32) * 0.5
    alpha = jnp.array([0.25], dtype=jnp.float32)                   # nn.PReLU() default

    # f32 path (exact semantics of the PyTorch module).
    y = se_module(x, w1, w2, alpha)
    jax.block_until_ready(y)
    y_ref = se_reference(x, w1, w2, alpha)
    assert jnp.allclose(y, y_ref, atol=1e-5, rtol=1e-5), "f32 mismatch vs reference"

    # Ragged batch (N=5) + non-lane-multiple spatial size (H=W=7 -> HW=49):
    # exercises the masked edge batch block and the full-extent lane block.
    x5 = jax.random.normal(jax.random.PRNGKey(1), (5, C, 7, 7), dtype=jnp.float32)
    y5 = se_module(x5, w1, w2, alpha)
    jax.block_until_ready(y5)
    assert jnp.allclose(y5, se_reference(x5, w1, w2, alpha), atol=1e-5, rtol=1e-5), \
        "ragged/odd-spatial f32 mismatch vs reference"

    # bf16 I/O path (halves HBM traffic on this memory-bound op; scale math in f32).
    x_bf = x.astype(jnp.bfloat16)
    y_bf = se_module(x_bf, w1, w2, alpha)
    jax.block_until_ready(y_bf)
    y_bf_ref = se_reference(x_bf, w1, w2, alpha)
    assert jnp.allclose(y_bf.astype(jnp.float32), y_bf_ref, atol=5e-2, rtol=5e-2), \
        "bf16 mismatch vs reference"

    print("KERNEL_OK")
</pallas_src>

<mosaic_0001>
module attributes {stable_mosaic.version = 11 : i64} {
  func.func @se_kernel(%arg0: i32, %arg1: memref<1xf32, #tpu.memory_space<smem>>, %arg2: memref<1x4x256xf32, #tpu.memory_space<vmem>>, %arg3: memref<4x2xf32, #tpu.memory_space<vmem>>, %arg4: memref<2x4xf32, #tpu.memory_space<vmem>>, %arg5: memref<1x4x256xf32, #tpu.memory_space<vmem>>) attributes {dimension_semantics = [#tpu.dimension_semantics<parallel>], iteration_bounds = array<i64: 2>, scalar_prefetch = 0 : i64, scratch_operands = 0 : i64, tpu.core_type = #tpu.core_type<tc>, window_params = [{transform_indices = @transform_0, window_bounds = array<i64: 1>}, {transform_indices = @transform_1, window_bounds = array<i64: 1, 4, 256>}, {pipeline_mode = #tpu.pipeline_mode<synchronous>, transform_indices = @transform_2, window_bounds = array<i64: 4, 2>}, {pipeline_mode = #tpu.pipeline_mode<synchronous>, transform_indices = @transform_3, window_bounds = array<i64: 2, 4>}, {transform_indices = @transform_4, window_bounds = array<i64: 1, 4, 256>}]} {
    %c0 = arith.constant 0 : index
    %c0_0 = arith.constant 0 : index
    %c0_1 = arith.constant 0 : index
    %0 = vector.load %arg2[%c0, %c0_0, %c0_1] : memref<1x4x256xf32, #tpu.memory_space<vmem>>, vector<1x4x256xf32>
    %cst = arith.constant dense<0.000000e+00> : vector<1x4xf32>
    %1 = vector.multi_reduction <add>, %0, %cst [2] : vector<1x4x256xf32> to vector<1x4xf32>
    %cst_2 = arith.constant 3.906250e-03 : f32
    %2 = vector.broadcast %cst_2 : f32 to vector<1x4xf32>
    %3 = arith.mulf %1, %2 : vector<1x4xf32>
    %c0_3 = arith.constant 0 : index
    %c0_4 = arith.constant 0 : index
    %4 = vector.load %arg3[%c0_3, %c0_4] : memref<4x2xf32, #tpu.memory_space<vmem>>, vector<4x2xf32>
    %cst_5 = arith.constant dense<0.000000e+00> : vector<1x2xf32>
    %5 = tpu.matmul %3, %4, %cst_5 {dimension_numbers = #tpu.dot_dimension_numbers<[1], [0], [0], [1], [0, 0, 1, 1], [], []>} : vector<1x4xf32>, vector<4x2xf32>, vector<1x2xf32> -> vector<1x2xf32>
    %c0_6 = arith.constant 0 : index
    %6 = memref.load %arg1[%c0_6] : memref<1xf32, #tpu.memory_space<smem>>
    %cst_7 = arith.constant 0.000000e+00 : f32
    %7 = vector.broadcast %cst_7 : f32 to vector<1x2xf32>
    %8 = arith.cmpf oge, %5, %7 : vector<1x2xf32>
    %9 = vector.broadcast %6 : f32 to vector<1x2xf32>
    %10 = arith.mulf %9, %5 : vector<1x2xf32>
    %11 = arith.select %8, %5, %10 : vector<1x2xi1>, vector<1x2xf32>
    %c0_8 = arith.constant 0 : index
    %c0_9 = arith.constant 0 : index
    %12 = vector.load %arg4[%c0_8, %c0_9] : memref<2x4xf32, #tpu.memory_space<vmem>>, vector<2x4xf32>
    %cst_10 = arith.constant dense<0.000000e+00> : vector<1x4xf32>
    %13 = tpu.matmul %11, %12, %cst_10 {dimension_numbers = #tpu.dot_dimension_numbers<[1], [0], [0], [1], [0, 0, 1, 1], [], []>} : vector<1x2xf32>, vector<2x4xf32>, vector<1x4xf32> -> vector<1x4xf32>
    %14 = arith.negf %13 : vector<1x4xf32>
    %15 = math.exp %14 : vector<1x4xf32>
    %cst_11 = arith.constant 1.000000e+00 : f32
    %16 = vector.broadcast %cst_11 : f32 to vector<1x4xf32>
    %17 = arith.addf %16, %15 : vector<1x4xf32>
    %18 = arith.divf %16, %17 : vector<1x4xf32>
    %19 = vector.shape_cast %18 : vector<1x4xf32> to vector<1x4x1xf32>
    %20 = vector.broadcast %19 : vector<1x4x1xf32> to vector<1x4x256xf32>
    %21 = arith.mulf %0, %20 : vector<1x4x256xf32>
    %c0_12 = arith.constant 0 : index
    %c0_13 = arith.constant 0 : index
    %c0_14 = arith.constant 0 : index
    %22 = vector.load %arg5[%c0_12, %c0_13, %c0_14] : memref<1x4x256xf32, #tpu.memory_space<vmem>>, vector<1x4x256xf32>
    tpu.vector_store %arg5[%c0_12, %c0_13, %c0_14], %21 {strides = array<i32>} : memref<1x4x256xf32, #tpu.memory_space<vmem>>, vector<1x4x256xf32>,
    return
  }
  func.func @transform_0(%arg0: i32) -> i32 {
    %c0_i32 = arith.constant 0 : i32
    %c0_i32_0 = arith.constant 0 : i32
    return %c0_i32 : i32
  }
  func.func @transform_1(%arg0: i32) -> (i32, i32, i32) {
    %c0_i32 = arith.constant 0 : i32
    %c0_i32_0 = arith.constant 0 : i32
    %c0_i32_1 = arith.constant 0 : i32
    return %arg0, %c0_i32, %c0_i32_0 : i32, i32, i32
  }
  func.func @transform_2(%arg0: i32) -> (i32, i32) {
    %c0_i32 = arith.constant 0 : i32
    %c0_i32_0 = arith.constant 0 : i32
    %c0_i32_1 = arith.constant 0 : i32
    return %c0_i32, %c0_i32_0 : i32, i32
  }
  func.func @transform_3(%arg0: i32) -> (i32, i32) {
    %c0_i32 = arith.constant 0 : i32
    %c0_i32_0 = arith.constant 0 : i32
    %c0_i32_1 = arith.constant 0 : i32
    return %c0_i32, %c0_i32_0 : i32, i32
  }
  func.func @transform_4(%arg0: i32) -> (i32, i32, i32) {
    %c0_i32 = arith.constant 0 : i32
    %c0_i32_0 = arith.constant 0 : i32
    %c0_i32_1 = arith.constant 0 : i32
    return %arg0, %c0_i32, %c0_i32_0 : i32, i32, i32
  }
}

</mosaic_0001>

<bundles_post_ra>
// kernel: tpu_custom_call.1
= control target key start
LH: loop header
LB: loop body
LE: loop exit
PB: predicated region body
PF: predicated region fallthrough
CT: control target
= control target key end

     0   :  { %s870_s0 = inlined_call_operand.<no memory space> [shape: f32[1], index: 0, kind: input, shape index: {}]   ;;  %s871_s1 = inlined_call_operand.hbm [shape: f32[2,4,256], index: 1, kind: input, shape index: {}]   ;;  %s872_s2 = inlined_call_operand.vmem [shape: f32[4,2], index: 2, kind: input, shape index: {}]   ;;  %s873_s3 = inlined_call_operand.vmem [shape: f32[2,4], index: 3, kind: input, shape index: {}]   ;;  %s874_s4 = inlined_call_operand.hbm [shape: f32[2,4,256], index: 4, kind: output, shape index: {}]  }
   0x1   :  { %9 = sst [smem:[#allocation2]] %s870_s0 }
   0x2   :  { %10 = vsyncpa [#allocation4], 0 }
   0x3   :  { %12 = vsyncpa [#allocation4 + $0x1], 0 }
   0x4   :  { %13 = vsyncpa [#allocation5], 0 }
   0x5   :  { %15 = vsyncpa [#allocation5 + $0x1], 0  ;;  %s719_s17 = smov 0   ;;  %s721_s18 = smov 0  }
   0x6   :  { %s723_s19 = smov 0   ;;  %s725_s20 = smov 0  }
   0x7 LB: > { %s740_s0 = sadd.s32 4294967295, %s684_s20   ;;  %s503_s21 = sadd.s32 4294967294, %s684_s20   ;;  %s684_s20 = sphi %s725_s20, %s891_s20   ;;  %s680_s19 = sphi %s723_s19, %s890_s19   ;;  %s676_s18 = sphi %s721_s18, %s889_s18   ;;  %s672_s17 = sphi %s719_s17, %s888_s17  }
   0x8   : > { %s744_s22 = sadd.s32 1, %s684_s20   ;;  %s49_s23 = sadd.s32 1, %s680_s19 }
   0x9   : > { %s46_s24 = ssub.s32 %s684_s20, %s744_s22  ;;  %p56_p0 = scmp.ne.s32.totalorder %s680_s19, %s676_s18 }
   0xa   : > { %p47_p1 = scmp.eq.s32.totalorder %s46_s24, 0  ;;  %p57_p2 = scmp.eq.s32.totalorder %s684_s20, 0 }
   0xb   : > { %p62_p3 = scmp.ne.s32.totalorder %s676_s18, %s672_s17  ;;  %p63_p4 = scmp.eq.s32.totalorder %s740_s0, 0 }
   0xc   : > { %s756_s25 = scalar_select %p47_p1, %s680_s19, %s49_s23  }
   0xd   : > { %p758_p5 = por %p57_p2, %p56_p0  ;;  %p762_p6 = por %p63_p4, %p62_p3 }
   0xe   : > { %p128_p7 = scmp.eq.s32.totalorder %s740_s0, 1  ;;  %p134_p8 = scmp.eq.s32.totalorder %s503_s21, 1 }
   0xf   : > { %s878_s27 = scalar_select %p762_p6, 1, 0 }
  0x10   : > { %p550_p10 = scmp.lt.s32.totalorder %s684_s20, 2  ;;  %p769_p11 = por %p128_p7, %p56_p0 }
  0x11   : > { %p773_p12 = por %p134_p8, %p62_p3  ;;  %s163_s30 = sand.u32 1, %s680_s19  }
  0x12   : > { %s879_s28 = scalar_select %p769_p11, 1, 0 }
  0x13   : > { %s880_s29 = scalar_select %p773_p12, 1, 0 }
  0x14   : > { %s522_s5 = sshll.u32 %s684_s20, 7  ;;  %s506_s6 = sshll.u32 %s163_s30, 3 }
  0x15   : > { %s782_s9 = scalar_lea.hbm %s871_s1, %s522_s5  ;;  %s167_s10 = scalar_lea.vmem [#allocation3], %s506_s6 }
  0x16   : > { %s175_s11 = sshll.u32 %s167_s10, 4  ;;  %p786_p13 = pnand %p550_p10, %p758_p5  ;;  %s790_s11 = int_to_ptr.vmem [resolvable:$true] %s175_s11 }
  0x17   : > { %s164_s13 = scalar_lea.sflag [#allocation4], %s163_s30  ;;  %s592_s14 = scalar_lea.hbm %s782_s9, 128 }
  0x18   : > { %p593_p2 = scmp.ne.s32.totalorder %s782_s9, %s592_s14  ;;  %p594_p3 = pneg %p786_p13 }
  0x19   : > { %s597_s21 = scalar_lea.hbm %s871_s1, 256  ;;  %p598_p5 = scmp.lt.s32.totalorder %s782_s9, %s871_s1 }
  0x1a   : > { %p595_p4 = pnand %p594_p3, %p593_p2  ;;  %p599_p8 = scmp.lt.s32.totalorder %s597_s21, %s592_s14 }
  0x1c   : > { %p596_p7 = pneg %p595_p4  ;;  %p600_p10 = por %p599_p8, %p598_p5 }
  0x1e   : > { %p601_p9 = pnand %p600_p10, %p596_p7 }
  0x20   : > { %604 = shalt.err (!%p601_p9)
}
  0x21   : > { %s605_s26 = scalar_lea.vmem %s790_s11, 128  ;;  %s686_s30 = smov [#allocation3]  }
  0x22   : > { %p606_p0 = scmp.ne.s32.totalorder %s790_s11, %s605_s26  ;;  %s610_s5 = sshll.u32 %s686_s30, 4  ;;  %s611_s5 = int_to_ptr.vmem [resolvable:$false] %s610_s5 }
  0x23   : > { %s612_s6 = scalar_lea.vmem %s611_s5, 256  ;;  %p613_p4 = scmp.lt.s32.totalorder %s790_s11, %s611_s5 }
  0x24   : > { %p608_p1 = pnand %p606_p0, %p594_p3  ;;  %p614_p12 = scmp.lt.s32.totalorder %s612_s6, %s605_s26 }
  0x26   : > { %p609_p2 = pneg %p608_p1  ;;  %p615_p11 = por %p614_p12, %p613_p4 }
  0x28   : > { %p616_p6 = pnand %p615_p11, %p609_p2 }
  0x2a   : > { %619 = shalt.err (!%p616_p6)
}
  0x2b   : > { %545 = dma.hbm_to_vmem [thread:$0]  (!%p786_p13), %s782_s9, 128, %s790_s11, %s164_s13  }
  0x2c   : > { %p882_p9 = scmp.lt.s32.totalorder %s684_s20, 3  ;;  %p883_p7 = scmp.ge.s32.totalorder %s684_s20, 1 }
  0x2e   : > { %p181_p0 = pnand %p883_p7, %p882_p9 }
  0x2f   : > { %s817_s7 = sand.u32 (!%p181_p0), 1, %s676_s18   ;;  %p884_p6 = scmp.ne.s32.totalorder (!%p181_p0), %s878_s27, 0 }
  0x30   : > { %184 = sbr.rel (%p181_p0) target bundleno = 757 (0x2f5), region = 36  ;;  %s510_s8 = sshll.u32 (!%p181_p0), %s817_s7, 3 }
  0x31   : > { %s187_s10 = scalar_lea.sflag (!%p181_p0), [#allocation4], %s817_s7  ;;  %s190_s12 = scalar_lea.vmem (!%p181_p0), [#allocation3], %s510_s8 }
  0x35   : > { %663 = dma.done.wait (%p884_p6), %s187_s10, 128  }
  0x36   : > { %665 = vsyncadd (%p884_p6), %s187_s10, 4294967168  ;;  %vm219_vm0 = vcmask 1043456   ;;  %v215_v0 = vld [vmem:[%s190_s12] sm:$0xff]  ;;  %v687_v5 = vmov 0.0   ;;  %vm688_vm1 = vmmov 0   ;;  %v228_v7 = vlaneseq  ;;  %s310_s14 = sld [smem:[#allocation2]] }
  0x37   : > { %v217_v1 = vcombine.high %v215_v0, %v215_v0  ;;  %v220_v2 = vsel %vm219_vm0, %v215_v0, 0.0  ;;  %528 = vmatprep.subr.mxu0 %v687_v5  ;;  %v226_v6 = vld [vmem:[%s872_s2] sm:$0xf]  ;;  %533 = vmatprep.subr.mxu1 %v687_v5  ;;  %vm234_vm2 = vcmask 31744   ;;  %vm320_vm3 = vcmask 1041408   ;;  %s523_s15 = sshll.u32 %s740_s0, 7 }
  0x38   : > { %529 = vmatpush3.msk.msra.mxu0 %vm219_vm0, %v226_v6  ;;  %530 = vmatprep.mubr.msk.f32.mxu0 %vm688_vm1, %v687_v5  ;;  %v229_v8 = vand.u32 127, %v228_v7  ;;  %v231_v9 = vshrl.u32 %v228_v7, 7  ;;  %v315_v14 = vld [vmem:[%s873_s3] sm:$0x3]  ;;  %vm316_vm5 = vcmask 15360   ;;  %s214_s16 = scalar_lea.vmem [#allocation6], %s510_s8  ;;  %s431_s26 = scalar_lea.hbm %s874_s4, %s523_s15 }
  0x39   : > { %v221_v3 = vsel %vm219_vm0, %v217_v1, 0.0  ;;  %535 = vmatprep.mubr.msk.f32.mxu1 %vm688_vm1, %v687_v5  ;;  %534 = vmatpush3.msk.msra.mxu1 %vm320_vm3, %v315_v14  ;;  %v689_v28 = vmov 839922192   ;;  %s433_s21 = sshll.u32 %s214_s16, 4  ;;  %s419_s30 = scalar_lea.sflag [#allocation5], %s817_s7  ;;  %s434_s21 = int_to_ptr.vmem [resolvable:$true] %s433_s21 }
  0x3a   : > { %v222_v4 = vadd.f32 %v221_v3, %v220_v2  ;;  %v232_v10 = vsub.s32 %v229_v8, %v231_v9  ;;  %v402_v25 = vsub.s32 0, %v231_v9  ;;  %v409_v29 = vunpack.c.l.s4 %v689_v28  ;;  %s620_s5 = scalar_lea.vmem %s434_s21, 128  ;;  %p885_p12 = scmp.ne.s32.totalorder %s879_s28, 0 }
  0x3b   : > { %p621_p11 = scmp.ne.s32.totalorder %s434_s21, %s620_s5  ;;  %s690_s6 = smov [#allocation6]  }
  0x3c   : > { %223 = vadd.xlane.f32.xlu0 %v222_v4  ;;  %v312_v15 = vstv %s310_s14  ;;  %v410_v30 = vunpack.c.0.s8 %v409_v29  ;;  %s624_s10 = sshll.u32 %s690_s6, 4  ;;  %s625_s10 = int_to_ptr.vmem [resolvable:$false] %s624_s10 }
  0x3d   : > { %p622_p13 = pnand %p621_p11, %p885_p12  ;;  %s626_s0 = scalar_lea.vmem %s625_s10, 256 }
  0x3e   : > { %v413_v31 = vsub.s32 %v410_v30, %v231_v9  ;;  %p627_p3 = scmp.lt.s32.totalorder %s434_s21, %s625_s10  ;;  %p628_p5 = scmp.lt.s32.totalorder %s626_s0, %s620_s5 }
  0x3f   : > { %p623_p1 = pneg %p622_p13 }
  0x40   : > { %p629_p8 = por %p628_p5, %p627_p3 }
  0x42   : > { %p630_p10 = pnand %p629_p8, %p623_p1 }
  0xc5   : > { %v224_v11 = vpop.xlane.xlu0 %223 }
  0xc6   : > { %v225_v12 = vmul.f32 0.00390625, %v224_v11 }
  0xc8   : > { %v233_v13 = vrot.slane %v225_v12, %v232_v10 }
  0xca   : > { %531 = vmatmul.mubr.msk.f32.vlgmr.msra.gmra.mxu0 %vm234_vm2, %v233_v13 }
 0x18a   : > { %v306_v16 = vpop.f32.mrf.mxu0 }
 0x18b   : > { %vm311_vm4 = vcmp.ge.f32.partialorder %v306_v16, 0.0  ;;  %v313_v17 = vmul.f32 %v312_v15, %v306_v16 }
 0x18c   : > { %v532_v18 = vpop.f32.mrf.mxu0 }
 0x18d   : > { %v314_v19 = vsel %vm311_vm4, %v306_v16, %v313_v17 }
 0x18e   : > { %536 = vmatmul.mubr.msk.f32.vlgmr.msra.gmra.mxu1 %vm316_vm5, %v314_v19 }
 0x24e   : > { %v390_v20 = vpop.f32.mrf.mxu1 }
 0x24f   : > { %v516_v21 = vmul.f32 -1.442695, %v390_v20 }
 0x250   : > { %v537_v22 = vpop.f32.mrf.mxu1 }
 0x251   : > { %588 = vpow2.f32 %v516_v21 }
 0x25e   : > { %v589_v23 = vpop.eup %588 }
 0x25f   : > { %v397_v24 = vadd.f32 1.0, %v589_v23 }
 0x261   : > { %590 = vrcp.f32 %v397_v24 }
 0x26e   : > { %v591_v26 = vpop.eup %590 }
 0x26f   : > { %v403_v27 = vrot.slane %v591_v26, %v402_v25 }
 0x271   : > { %405 = vbcast.lane.b32.xlu0 %v403_v27, 256 }
 0x2e3   : > { %v406_v32 = vpop.permute.xlu0 %405 }
 0x2e4   : > { %v414_v33 = vrot.slane %v406_v32, %v413_v31 }
 0x2e6   : > { %v416_v34 = vmul.f32 %v414_v33, %v215_v0 }
 0x2e8   : > { %417 = vst [vmem:[%s214_s16] sm:$0xff] %v416_v34 }
 0x2e9   : > { %633 = shalt.err (!%p630_p10)
}
 0x2ea   : > { %s634_s8 = scalar_lea.hbm %s431_s26, 128  ;;  %s638_s9 = scalar_lea.hbm %s874_s4, 256 }
 0x2eb   : > { %p635_p2 = scmp.ne.s32.totalorder %s431_s26, %s634_s8  ;;  %p639_p7 = scmp.lt.s32.totalorder %s431_s26, %s874_s4 }
 0x2ec   : > { %p640_p0 = scmp.lt.s32.totalorder %s638_s9, %s634_s8 }
 0x2ed   : > { %p636_p4 = pnand %p635_p2, %p885_p12 }
 0x2ee   : > { %p641_p6 = por %p640_p0, %p639_p7 }
 0x2ef   : > { %p637_p9 = pneg %p636_p4 }
 0x2f1   : > { %p642_p11 = pnand %p641_p6, %p637_p9 }
 0x2f3   : > { %645 = shalt.err (!%p642_p11)
}
 0x2f4   : > { %540 = dma.vmem_to_hbm [thread:$0]  (%p885_p12), %s434_s21, 128, %s431_s26, %s419_s30  }
 0x2f5 PF: > { %s445_s13 = sand.u32 1, %s672_s17   ;;  %p886_p13 = scmp.ne.s32.totalorder %s880_s29, 0 }
 0x2f6   : > { %p887_p1 = scmp.ge.s32.totalorder %s684_s20, 2  ;;  %s446_s14 = scalar_lea.sflag [#allocation5], %s445_s13 }
 0x2f8   : > { %p547_p3 = pnand %p887_p1, %p886_p13 }
 0x2fa   : > { %p548_p5 = pneg %p547_p3 }
 0x2fc   : > { %667 = dma.done.wait (%p548_p5), %s446_s14, 128  }
 0x2fd   : > { %669 = vsyncadd (%p548_p5), %s446_s14, 4294967168  ;;  %p18_p8 = scmp.ge.s32.totalorder %s744_s22, 4   ;;  %s888_s17 = smov %s676_s18 }
 0x2fe   : > { %s889_s18 = smov %s680_s19  ;;  %s890_s19 = smov %s756_s25 }
 0x2ff   : > { %s891_s20 = smov %s744_s22  ;;  %20 = sbr.rel (!%p18_p8) target bundleno = 7 (0x7), region = 81 }
 0x304   :  { %451 = vsyncpa [#allocation4], 1 }
 0x305   :  { %453 = vsyncpa [#allocation4 + $0x1], 1 }
 0x306   :  { %454 = vsyncpa [#allocation5], 1 }
 0x307   :  { %456 = vsyncpa [#allocation5 + $0x1], 1 }

</bundles_post_ra>
